<compile_context>
chip_gen: v5e
topology: v5e:2x2
jax: 0.10.0
libtpu: 0.0.40
codegen_flags: <defaults>
</compile_context>

<pallas_src>
import functools

import jax
import jax.numpy as jnp
from jax.experimental import pallas as pl
from jax.experimental.pallas import tpu as pltpu


def _round_up(x, m):
    return ((x + m - 1) // m) * m


def _neucf_kernel(num_hidden_layers, compute_dtype, *refs):
    """Batch-on-lanes NeuCF forward.

    refs = (u_mlp, i_mlp, u_gmf, i_gmf,            # (F, TILE_B) activation tiles
            w0u_t, w0i_t, b0,                      # first MLP layer (concat split)
            w1_t, b1, ..., w_{L-1}_t, b_{L-1},     # remaining MLP layers
            wf_gmf_col, wf_mlp_col, bf,            # NeuMF head (concat split)
            out)                                   # (1, TILE_B)
    """
    out_ref = refs[-1]
    f32 = jnp.float32

    u_mlp = refs[0][...]                   # (d_mlp, TILE_B) compute_dtype
    i_mlp = refs[1][...]
    u_gmf = refs[2][...].astype(f32)       # GMF path is elementwise-only: f32
    i_gmf = refs[3][...].astype(f32)

    # ---- GMF branch: elementwise product (VPU, f32) ----
    gmf = u_gmf * i_gmf                    # (d_gmf, TILE_B)

    # ---- MLP branch (transposed): (concat([u,i]) @ W0)^T = W0u^T@u^T + W0i^T@i^T ----
    w0u = refs[4][...]
    w0i = refs[5][...]
    b0 = refs[6][...]                      # (n0, 1) f32
    x = (jnp.dot(w0u, u_mlp, preferred_element_type=f32)
         + jnp.dot(w0i, i_mlp, preferred_element_type=f32)
         + b0)
    x = jnp.maximum(x, 0.0)

    idx = 7
    for _ in range(num_hidden_layers - 1):
        w = refs[idx][...]
        b = refs[idx + 1][...]
        idx += 2
        x = jnp.dot(w, x.astype(compute_dtype), preferred_element_type=f32) + b
        x = jnp.maximum(x, 0.0)

    # ---- NeuMF head: 1-column matmul replaced by VPU mul + sublane reduce ----
    wf_gmf = refs[idx][...]                # (d_gmf, 1) f32
    wf_mlp = refs[idx + 1][...]            # (n_last, 1) f32
    bf = refs[idx + 2][...]                # (1, 1) f32
    out = (jnp.sum(gmf * wf_gmf, axis=0, keepdims=True)
           + jnp.sum(x * wf_mlp, axis=0, keepdims=True)
           + bf)
    out_ref[...] = out.astype(out_ref.dtype)


def _vmem_limit_bytes(act_args, const_args, tile_b):
    """Resident weights + 2x double-buffered activation/output tiles + slack."""
    resident = sum(int(a.size) * a.dtype.itemsize for a in const_args)
    per_step = sum(int(a.shape[0]) * tile_b * a.dtype.itemsize for a in act_args)
    per_step += tile_b * 4                 # (1, TILE_B) f32 output tile
    need = resident + 2 * per_step + (2 << 20)
    # Floor at the tightest default scoped limit (v5e: 16 MiB); cap safely below
    # v7x's 64 MiB physical VMEM.
    return int(max(16 << 20, min(need, 48 << 20)))


def init_neucf_params(key, config):
    """Deterministic parameter init (embeddings ~ N(0,1); Linear ~ U(-1/sqrt(in), 1/sqrt(in)))."""
    num_users = config['num_users']
    num_items = config['num_items']
    d_mlp = config['mlp_latent_vector_dim']
    d_gmf = config['gmf_latent_vector_dim']
    neurons = config['mlp_layer_neurons']
    assert neurons[0] == 2 * d_mlp, "first MLP layer input must equal 2 * mlp_latent_vector_dim"

    keys = jax.random.split(key, 8 + 2 * len(neurons))
    ki = iter(range(len(keys)))

    params = {}
    params['emb_user_gmf'] = jax.random.normal(keys[next(ki)], (num_users, d_gmf), jnp.float32)
    params['emb_item_gmf'] = jax.random.normal(keys[next(ki)], (num_items, d_gmf), jnp.float32)
    params['emb_user_mlp'] = jax.random.normal(keys[next(ki)], (num_users, d_mlp), jnp.float32)
    params['emb_item_mlp'] = jax.random.normal(keys[next(ki)], (num_items, d_mlp), jnp.float32)

    def linear(kw, kb, fan_in, fan_out):
        bound = 1.0 / jnp.sqrt(fan_in)
        w = jax.random.uniform(kw, (fan_in, fan_out), jnp.float32, -bound, bound)
        b = jax.random.uniform(kb, (1, fan_out), jnp.float32, -bound, bound)
        return w, b

    mlp_weights = []
    for in_size, out_size in zip(neurons[:-1], neurons[1:]):
        w, b = linear(keys[next(ki)], keys[next(ki)], in_size, out_size)
        mlp_weights.append((w, b))
    params['mlp_layers'] = mlp_weights

    wf, bf = linear(keys[next(ki)], keys[next(ki)], neurons[-1] + d_gmf, 1)
    params['neumf_w'] = wf
    params['neumf_b'] = bf
    return params


def neucf_forward(params, user_indices, item_indices, config, *,
                  tile_b=512, compute_dtype=jnp.bfloat16):
    d_mlp = config['mlp_latent_vector_dim']
    d_gmf = config['gmf_latent_vector_dim']
    neurons = config['mlp_layer_neurons']
    num_hidden = len(neurons) - 1
    B = user_indices.shape[0]
    f32 = jnp.float32

    # Embedding gathers (glue, plain JAX).
    u_mlp = jnp.take(params['emb_user_mlp'], user_indices, axis=0)
    i_mlp = jnp.take(params['emb_item_mlp'], item_indices, axis=0)
    u_gmf = jnp.take(params['emb_user_gmf'], user_indices, axis=0)
    i_gmf = jnp.take(params['emb_item_gmf'], item_indices, axis=0)

    # Batch-on-lanes layout: pad B up to a lane-dense tile and transpose to (F, B_pad).
    tile_b = max(128, (tile_b // 128) * 128)
    b_pad = _round_up(B, 128)
    tile_b = min(tile_b, b_pad)
    b_pad = _round_up(b_pad, tile_b)
    grid = (b_pad // tile_b,)

    def to_lanes(a, dtype):
        a = a.astype(dtype).T                        # (F, B)
        return jnp.pad(a, ((0, 0), (0, b_pad - B)))  # (F, B_pad)

    acts = [
        to_lanes(u_mlp, compute_dtype),   # feed the MXU
        to_lanes(i_mlp, compute_dtype),
        to_lanes(u_gmf, f32),             # GMF branch is VPU-only: keep f32
        to_lanes(i_gmf, f32),
    ]

    # Pre-transpose weights (y^T = W^T @ x^T); split concat consumers.
    w0, b0 = params['mlp_layers'][0]
    w0_t = w0.T                                      # (n0, 2*d_mlp)
    consts = [
        w0_t[:, :d_mlp].astype(compute_dtype),
        w0_t[:, d_mlp:].astype(compute_dtype),
        b0.reshape(-1, 1).astype(f32),
    ]
    for w, b in params['mlp_layers'][1:]:
        consts += [w.T.astype(compute_dtype), b.reshape(-1, 1).astype(f32)]
    wf = params['neumf_w']                           # (d_gmf + n_last, 1)
    consts += [
        wf[:d_gmf].astype(f32),                      # (d_gmf, 1)
        wf[d_gmf:].astype(f32),                      # (n_last, 1)
        params['neumf_b'].reshape(1, 1).astype(f32),
    ]

    act_specs = [pl.BlockSpec((a.shape[0], tile_b), lambda b: (0, b)) for a in acts]
    const_specs = [pl.BlockSpec(c.shape, lambda b: (0, 0)) for c in consts]
    out_spec = pl.BlockSpec((1, tile_b), lambda b: (0, b))

    kernel = functools.partial(_neucf_kernel, num_hidden, compute_dtype)

    out = pl.pallas_call(
        kernel,
        out_shape=jax.ShapeDtypeStruct((1, b_pad), f32),
        grid_spec=pltpu.PrefetchScalarGridSpec(
            num_scalar_prefetch=0,
            grid=grid,
            in_specs=act_specs + const_specs,
            out_specs=out_spec,
        ),
        compiler_params=pltpu.CompilerParams(
            dimension_semantics=("parallel",),
            vmem_limit_bytes=_vmem_limit_bytes(acts, consts, tile_b),
        ),
    )(*(acts + consts))
    return out[0, :B]  # matches torch out.view(-1)


def neucf_reference(params, user_indices, item_indices, config):
    """Pure-JAX f32 reference (mirrors the PyTorch forward exactly)."""
    u_mlp = jnp.take(params['emb_user_mlp'], user_indices, axis=0)
    i_mlp = jnp.take(params['emb_item_mlp'], item_indices, axis=0)
    u_gmf = jnp.take(params['emb_user_gmf'], user_indices, axis=0)
    i_gmf = jnp.take(params['emb_item_gmf'], item_indices, axis=0)
    gmf = u_gmf * i_gmf
    x = jnp.concatenate([u_mlp, i_mlp], axis=-1)
    for w, b in params['mlp_layers']:
        x = jnp.maximum(x @ w + b, 0.0)
    out = jnp.concatenate([gmf, x], axis=-1) @ params['neumf_w'] + params['neumf_b']
    return out.reshape(-1)


if __name__ == "__main__":
    config_nuemf = {
        'num_users': 32,
        'num_items': 64,
        'mlp_latent_vector_dim': 16,
        'gmf_latent_vector_dim': 8,
        'mlp_layer_neurons': [32, 32, 16, 8],   # first entry = 2 * mlp_latent_vector_dim
    }
    B = 8

    key = jax.random.PRNGKey(0)
    k_params, k_u, k_i = jax.random.split(key, 3)
    params = init_neucf_params(k_params, config_nuemf)

    user_indices = jax.random.randint(k_u, (B,), 0, config_nuemf['num_users'], dtype=jnp.int32)
    item_indices = jax.random.randint(k_i, (B,), 0, config_nuemf['num_items'], dtype=jnp.int32)

    ref = neucf_reference(params, user_indices, item_indices, config_nuemf)

    # Exact-precision path: proves the transposed/gridded kernel matches the
    # PyTorch forward bit-for-bit up to f32 accumulation order.
    out_f32 = neucf_forward(params, user_indices, item_indices, config_nuemf,
                            compute_dtype=jnp.float32)
    out_f32 = jax.block_until_ready(out_f32)
    assert out_f32.shape == (B,), out_f32.shape
    assert jnp.allclose(out_f32, ref, atol=1e-5, rtol=1e-5), (out_f32, ref)

    # bf16-operand path (halved HBM traffic, f32 accumulation): loose tolerance.
    out_bf16 = neucf_forward(params, user_indices, item_indices, config_nuemf,
                             compute_dtype=jnp.bfloat16)
    out_bf16 = jax.block_until_ready(out_bf16)
    assert out_bf16.shape == (B,), out_bf16.shape
    assert jnp.allclose(out_bf16, ref, atol=1e-1, rtol=1e-1), (out_bf16, ref)

    print("KERNEL_OK")
</pallas_src>

<mosaic_0001>
module attributes {stable_mosaic.version = 11 : i64} {
  func.func @_neucf_kernel(%arg0: i32, %arg1: memref<16x128xf32, #tpu.memory_space<vmem>>, %arg2: memref<16x128xf32, #tpu.memory_space<vmem>>, %arg3: memref<8x128xf32, #tpu.memory_space<vmem>>, %arg4: memref<8x128xf32, #tpu.memory_space<vmem>>, %arg5: memref<32x16xf32, #tpu.memory_space<vmem>>, %arg6: memref<32x16xf32, #tpu.memory_space<vmem>>, %arg7: memref<32x1xf32, #tpu.memory_space<vmem>>, %arg8: memref<16x32xf32, #tpu.memory_space<vmem>>, %arg9: memref<16x1xf32, #tpu.memory_space<vmem>>, %arg10: memref<8x16xf32, #tpu.memory_space<vmem>>, %arg11: memref<8x1xf32, #tpu.memory_space<vmem>>, %arg12: memref<8x1xf32, #tpu.memory_space<vmem>>, %arg13: memref<8x1xf32, #tpu.memory_space<vmem>>, %arg14: memref<1x1xf32, #tpu.memory_space<vmem>>, %arg15: memref<1x128xf32, #tpu.memory_space<vmem>>) attributes {dimension_semantics = [#tpu.dimension_semantics<parallel>], iteration_bounds = array<i64: 1>, scalar_prefetch = 0 : i64, scratch_operands = 0 : i64, tpu.core_type = #tpu.core_type<tc>, window_params = [{transform_indices = @transform_0, window_bounds = array<i64: 16, 128>}, {transform_indices = @transform_1, window_bounds = array<i64: 16, 128>}, {transform_indices = @transform_2, window_bounds = array<i64: 8, 128>}, {transform_indices = @transform_3, window_bounds = array<i64: 8, 128>}, {pipeline_mode = #tpu.pipeline_mode<synchronous>, transform_indices = @transform_4, window_bounds = array<i64: 32, 16>}, {pipeline_mode = #tpu.pipeline_mode<synchronous>, transform_indices = @transform_5, window_bounds = array<i64: 32, 16>}, {pipeline_mode = #tpu.pipeline_mode<synchronous>, transform_indices = @transform_6, window_bounds = array<i64: 32, 1>}, {pipeline_mode = #tpu.pipeline_mode<synchronous>, transform_indices = @transform_7, window_bounds = array<i64: 16, 32>}, {pipeline_mode = #tpu.pipeline_mode<synchronous>, transform_indices = @transform_8, window_bounds = array<i64: 16, 1>}, {pipeline_mode = #tpu.pipeline_mode<synchronous>, transform_indices = @transform_9, window_bounds = array<i64: 8, 16>}, {pipeline_mode = #tpu.pipeline_mode<synchronous>, transform_indices = @transform_10, window_bounds = array<i64: 8, 1>}, {pipeline_mode = #tpu.pipeline_mode<synchronous>, transform_indices = @transform_11, window_bounds = array<i64: 8, 1>}, {pipeline_mode = #tpu.pipeline_mode<synchronous>, transform_indices = @transform_12, window_bounds = array<i64: 8, 1>}, {pipeline_mode = #tpu.pipeline_mode<synchronous>, transform_indices = @transform_13, window_bounds = array<i64: 1, 1>}, {transform_indices = @transform_14, window_bounds = array<i64: 1, 128>}]} {
    %c0 = arith.constant 0 : index
    %c0_0 = arith.constant 0 : index
    %0 = vector.load %arg1[%c0, %c0_0] : memref<16x128xf32, #tpu.memory_space<vmem>>, vector<16x128xf32>
    %c0_1 = arith.constant 0 : index
    %c0_2 = arith.constant 0 : index
    %1 = vector.load %arg2[%c0_1, %c0_2] : memref<16x128xf32, #tpu.memory_space<vmem>>, vector<16x128xf32>
    %c0_3 = arith.constant 0 : index
    %c0_4 = arith.constant 0 : index
    %2 = vector.load %arg3[%c0_3, %c0_4] : memref<8x128xf32, #tpu.memory_space<vmem>>, vector<8x128xf32>
    %c0_5 = arith.constant 0 : index
    %c0_6 = arith.constant 0 : index
    %3 = vector.load %arg4[%c0_5, %c0_6] : memref<8x128xf32, #tpu.memory_space<vmem>>, vector<8x128xf32>
    %4 = arith.mulf %2, %3 : vector<8x128xf32>
    %c0_7 = arith.constant 0 : index
    %c0_8 = arith.constant 0 : index
    %5 = vector.load %arg5[%c0_7, %c0_8] : memref<32x16xf32, #tpu.memory_space<vmem>>, vector<32x16xf32>
    %c0_9 = arith.constant 0 : index
    %c0_10 = arith.constant 0 : index
    %6 = vector.load %arg6[%c0_9, %c0_10] : memref<32x16xf32, #tpu.memory_space<vmem>>, vector<32x16xf32>
    %c0_11 = arith.constant 0 : index
    %c0_12 = arith.constant 0 : index
    %7 = vector.load %arg7[%c0_11, %c0_12] : memref<32x1xf32, #tpu.memory_space<vmem>>, vector<32x1xf32>
    %cst = arith.constant dense<0.000000e+00> : vector<32x128xf32>
    %8 = tpu.matmul %5, %0, %cst {dimension_numbers = #tpu.dot_dimension_numbers<[1], [0], [0], [1], [0, 0, 1, 1], [], []>} : vector<32x16xf32>, vector<16x128xf32>, vector<32x128xf32> -> vector<32x128xf32>
    %cst_13 = arith.constant dense<0.000000e+00> : vector<32x128xf32>
    %9 = tpu.matmul %6, %1, %cst_13 {dimension_numbers = #tpu.dot_dimension_numbers<[1], [0], [0], [1], [0, 0, 1, 1], [], []>} : vector<32x16xf32>, vector<16x128xf32>, vector<32x128xf32> -> vector<32x128xf32>
    %10 = arith.addf %8, %9 : vector<32x128xf32>
    %11 = vector.broadcast %7 : vector<32x1xf32> to vector<32x128xf32>
    %12 = arith.addf %10, %11 : vector<32x128xf32>
    %cst_14 = arith.constant 0.000000e+00 : f32
    %13 = vector.broadcast %cst_14 : f32 to vector<32x128xf32>
    %14 = arith.maximumf %12, %13 : vector<32x128xf32>
    %c0_15 = arith.constant 0 : index
    %c0_16 = arith.constant 0 : index
    %15 = vector.load %arg8[%c0_15, %c0_16] : memref<16x32xf32, #tpu.memory_space<vmem>>, vector<16x32xf32>
    %c0_17 = arith.constant 0 : index
    %c0_18 = arith.constant 0 : index
    %16 = vector.load %arg9[%c0_17, %c0_18] : memref<16x1xf32, #tpu.memory_space<vmem>>, vector<16x1xf32>
    %cst_19 = arith.constant dense<0.000000e+00> : vector<16x128xf32>
    %17 = tpu.matmul %15, %14, %cst_19 {dimension_numbers = #tpu.dot_dimension_numbers<[1], [0], [0], [1], [0, 0, 1, 1], [], []>} : vector<16x32xf32>, vector<32x128xf32>, vector<16x128xf32> -> vector<16x128xf32>
    %18 = vector.broadcast %16 : vector<16x1xf32> to vector<16x128xf32>
    %19 = arith.addf %17, %18 : vector<16x128xf32>
    %cst_20 = arith.constant 0.000000e+00 : f32
    %20 = vector.broadcast %cst_20 : f32 to vector<16x128xf32>
    %21 = arith.maximumf %19, %20 : vector<16x128xf32>
    %c0_21 = arith.constant 0 : index
    %c0_22 = arith.constant 0 : index
    %22 = vector.load %arg10[%c0_21, %c0_22] : memref<8x16xf32, #tpu.memory_space<vmem>>, vector<8x16xf32>
    %c0_23 = arith.constant 0 : index
    %c0_24 = arith.constant 0 : index
    %23 = vector.load %arg11[%c0_23, %c0_24] : memref<8x1xf32, #tpu.memory_space<vmem>>, vector<8x1xf32>
    %cst_25 = arith.constant dense<0.000000e+00> : vector<8x128xf32>
    %24 = tpu.matmul %22, %21, %cst_25 {dimension_numbers = #tpu.dot_dimension_numbers<[1], [0], [0], [1], [0, 0, 1, 1], [], []>} : vector<8x16xf32>, vector<16x128xf32>, vector<8x128xf32> -> vector<8x128xf32>
    %25 = vector.broadcast %23 : vector<8x1xf32> to vector<8x128xf32>
    %26 = arith.addf %24, %25 : vector<8x128xf32>
    %cst_26 = arith.constant 0.000000e+00 : f32
    %27 = vector.broadcast %cst_26 : f32 to vector<8x128xf32>
    %28 = arith.maximumf %26, %27 : vector<8x128xf32>
    %c0_27 = arith.constant 0 : index
    %c0_28 = arith.constant 0 : index
    %29 = vector.load %arg12[%c0_27, %c0_28] : memref<8x1xf32, #tpu.memory_space<vmem>>, vector<8x1xf32>
    %c0_29 = arith.constant 0 : index
    %c0_30 = arith.constant 0 : index
    %30 = vector.load %arg13[%c0_29, %c0_30] : memref<8x1xf32, #tpu.memory_space<vmem>>, vector<8x1xf32>
    %c0_31 = arith.constant 0 : index
    %c0_32 = arith.constant 0 : index
    %31 = vector.load %arg14[%c0_31, %c0_32] : memref<1x1xf32, #tpu.memory_space<vmem>>, vector<1x1xf32>
    %32 = vector.broadcast %29 : vector<8x1xf32> to vector<8x128xf32>
    %33 = arith.mulf %4, %32 : vector<8x128xf32>
    %cst_33 = arith.constant dense<0.000000e+00> : vector<128xf32>
    %34 = vector.multi_reduction <add>, %33, %cst_33 [0] : vector<8x128xf32> to vector<128xf32>
    %35 = vector.shape_cast %34 : vector<128xf32> to vector<1x128xf32>
    %36 = vector.broadcast %30 : vector<8x1xf32> to vector<8x128xf32>
    %37 = arith.mulf %28, %36 : vector<8x128xf32>
    %cst_34 = arith.constant dense<0.000000e+00> : vector<128xf32>
    %38 = vector.multi_reduction <add>, %37, %cst_34 [0] : vector<8x128xf32> to vector<128xf32>
    %39 = vector.shape_cast %38 : vector<128xf32> to vector<1x128xf32>
    %40 = arith.addf %35, %39 : vector<1x128xf32>
    %41 = vector.broadcast %31 : vector<1x1xf32> to vector<1x128xf32>
    %42 = arith.addf %40, %41 : vector<1x128xf32>
    %c0_35 = arith.constant 0 : index
    %c0_36 = arith.constant 0 : index
    %43 = vector.load %arg15[%c0_35, %c0_36] : memref<1x128xf32, #tpu.memory_space<vmem>>, vector<1x128xf32>
    tpu.vector_store %arg15[%c0_35, %c0_36], %42 {strides = array<i32>} : memref<1x128xf32, #tpu.memory_space<vmem>>, vector<1x128xf32>,
    return
  }
  func.func @transform_0(%arg0: i32) -> (i32, i32) {
    %c0_i32 = arith.constant 0 : i32
    %c0_i32_0 = arith.constant 0 : i32
    return %c0_i32, %arg0 : i32, i32
  }
  func.func @transform_1(%arg0: i32) -> (i32, i32) {
    %c0_i32 = arith.constant 0 : i32
    %c0_i32_0 = arith.constant 0 : i32
    return %c0_i32, %arg0 : i32, i32
  }
  func.func @transform_2(%arg0: i32) -> (i32, i32) {
    %c0_i32 = arith.constant 0 : i32
    %c0_i32_0 = arith.constant 0 : i32
    return %c0_i32, %arg0 : i32, i32
  }
  func.func @transform_3(%arg0: i32) -> (i32, i32) {
    %c0_i32 = arith.constant 0 : i32
    %c0_i32_0 = arith.constant 0 : i32
    return %c0_i32, %arg0 : i32, i32
  }
  func.func @transform_4(%arg0: i32) -> (i32, i32) {
    %c0_i32 = arith.constant 0 : i32
    %c0_i32_0 = arith.constant 0 : i32
    %c0_i32_1 = arith.constant 0 : i32
    return %c0_i32, %c0_i32_0 : i32, i32
  }
  func.func @transform_5(%arg0: i32) -> (i32, i32) {
    %c0_i32 = arith.constant 0 : i32
    %c0_i32_0 = arith.constant 0 : i32
    %c0_i32_1 = arith.constant 0 : i32
    return %c0_i32, %c0_i32_0 : i32, i32
  }
  func.func @transform_6(%arg0: i32) -> (i32, i32) {
    %c0_i32 = arith.constant 0 : i32
    %c0_i32_0 = arith.constant 0 : i32
    %c0_i32_1 = arith.constant 0 : i32
    return %c0_i32, %c0_i32_0 : i32, i32
  }
  func.func @transform_7(%arg0: i32) -> (i32, i32) {
    %c0_i32 = arith.constant 0 : i32
    %c0_i32_0 = arith.constant 0 : i32
    %c0_i32_1 = arith.constant 0 : i32
    return %c0_i32, %c0_i32_0 : i32, i32
  }
  func.func @transform_8(%arg0: i32) -> (i32, i32) {
    %c0_i32 = arith.constant 0 : i32
    %c0_i32_0 = arith.constant 0 : i32
    %c0_i32_1 = arith.constant 0 : i32
    return %c0_i32, %c0_i32_0 : i32, i32
  }
  func.func @transform_9(%arg0: i32) -> (i32, i32) {
    %c0_i32 = arith.constant 0 : i32
    %c0_i32_0 = arith.constant 0 : i32
    %c0_i32_1 = arith.constant 0 : i32
    return %c0_i32, %c0_i32_0 : i32, i32
  }
  func.func @transform_10(%arg0: i32) -> (i32, i32) {
    %c0_i32 = arith.constant 0 : i32
    %c0_i32_0 = arith.constant 0 : i32
    %c0_i32_1 = arith.constant 0 : i32
    return %c0_i32, %c0_i32_0 : i32, i32
  }
  func.func @transform_11(%arg0: i32) -> (i32, i32) {
    %c0_i32 = arith.constant 0 : i32
    %c0_i32_0 = arith.constant 0 : i32
    %c0_i32_1 = arith.constant 0 : i32
    return %c0_i32, %c0_i32_0 : i32, i32
  }
  func.func @transform_12(%arg0: i32) -> (i32, i32) {
    %c0_i32 = arith.constant 0 : i32
    %c0_i32_0 = arith.constant 0 : i32
    %c0_i32_1 = arith.constant 0 : i32
    return %c0_i32, %c0_i32_0 : i32, i32
  }
  func.func @transform_13(%arg0: i32) -> (i32, i32) {
    %c0_i32 = arith.constant 0 : i32
    %c0_i32_0 = arith.constant 0 : i32
    %c0_i32_1 = arith.constant 0 : i32
    return %c0_i32, %c0_i32_0 : i32, i32
  }
  func.func @transform_14(%arg0: i32) -> (i32, i32) {
    %c0_i32 = arith.constant 0 : i32
    %c0_i32_0 = arith.constant 0 : i32
    return %c0_i32, %arg0 : i32, i32
  }
}

</mosaic_0001>

<bundles_post_ra>
// kernel: tpu_custom_call.1
= control target key start
LH: loop header
LB: loop body
LE: loop exit
PB: predicated region body
PF: predicated region fallthrough
CT: control target
= control target key end

     0   :  { %s525_s0 = inlined_call_operand.vmem [shape: f32[16,128], index: 0, kind: input, shape index: {}]   ;;  %s526_s1 = inlined_call_operand.vmem [shape: f32[16,128], index: 1, kind: input, shape index: {}]   ;;  %s527_s2 = inlined_call_operand.vmem [shape: f32[8,128], index: 2, kind: input, shape index: {}]   ;;  %s528_s3 = inlined_call_operand.vmem [shape: f32[8,128], index: 3, kind: input, shape index: {}]   ;;  %s529_s4 = inlined_call_operand.vmem [shape: f32[32,16], index: 4, kind: input, shape index: {}]   ;;  %s530_s5 = inlined_call_operand.vmem [shape: f32[32,16], index: 5, kind: input, shape index: {}]   ;;  %s531_s6 = inlined_call_operand.vmem [shape: f32[32,1], index: 6, kind: input, shape index: {}]   ;;  %s532_s7 = inlined_call_operand.vmem [shape: f32[16,32], index: 7, kind: input, shape index: {}]   ;;  %s533_s8 = inlined_call_operand.vmem [shape: f32[16,1], index: 8, kind: input, shape index: {}]   ;;  %s534_s9 = inlined_call_operand.vmem [shape: f32[8,16], index: 9, kind: input, shape index: {}]   ;;  %s535_s10 = inlined_call_operand.vmem [shape: f32[8,1], index: 10, kind: input, shape index: {}]   ;;  %s536_s11 = inlined_call_operand.vmem [shape: f32[8,1], index: 11, kind: input, shape index: {}]   ;;  %s537_s12 = inlined_call_operand.vmem [shape: f32[8,1], index: 12, kind: input, shape index: {}]   ;;  %s538_s13 = inlined_call_operand.<no memory space> [shape: f32[1,1], index: 13, kind: input, shape index: {}]   ;;  %s539_s14 = inlined_call_operand.hbm [shape: f32[1,128], index: 14, kind: output, shape index: {}]  }
   0x1   :  { %v19_v0 = vstv %s538_s13 }
   0x2   :  { %20 = vst [vmem:[#allocation2] sm:$0x1] %v19_v0 }
   0x3   :  { %v53_v1 = vld [vmem:[%s526_s1 + $0x8] sm:$0xff]  ;;  %v68_v3 = vld [vmem:[%s531_s6 + $0x18] sm:$0xff]  ;;  %v355_v4 = vmov 0   ;;  %v52_v5 = vld [vmem:[%s526_s1] sm:$0xff]  ;;  %vm69_vm0 = vcmask 130048  }
   0x4   :  { %v51_v2 = vld [vmem:[%s525_s0 + $0x8] sm:$0xff]  ;;  %326 = vset.pattern.permute.xlu0 %v355_v4  ;;  %96 = vmatpush.msra.mxu0 %v53_v1  ;;  %v50_v6 = vld [vmem:[%s525_s0] sm:$0xff]  ;;  %v64_v8 = vld [vmem:[%s530_s5 + $0x18] sm:$0xff] }
   0x5   :  { %320 = vmatpush.msra.mxu3 %v53_v1  ;;  %137 = vmatpush.msra.mxu1 %v51_v2  ;;  %v61_v7 = vld [vmem:[%s530_s5] sm:$0xff]  ;;  %v66_v10 = vld [vmem:[%s531_s6 + $0x8] sm:$0xff] }
   0x6   :  { %169 = vperm.xlu0 %326, %v68_v3   ;;  %97 = vmatpush.msra.mxu0 %v52_v5  ;;  %v57_v9 = vld [vmem:[%s529_s4] sm:$0xff] }
   0x7   :  { %321 = vmatpush.msra.mxu3 %v52_v5  ;;  %138 = vmatpush.msra.mxu1 %v50_v6 }
   0x8   :  { %309 = vmatmul.msk.f32.vlgmr.msra.gmra.mxu0 %vm69_vm0, %v61_v7  ;;  %312 = vmatmul.msk.f32.vlgmr.msra.gmra.mxu3 %vm69_vm0, %v64_v8 }
   0x9   :  { %313 = vmatmul.msk.f32.vlgmr.msra.gmra.mxu1 %vm69_vm0, %v57_v9  ;;  %327 = vset.pattern.permute.xlu1 %v355_v4 }
   0xa   :  { %21 = vsyncpa [#allocation4], 0  ;;  %159 = vperm.xlu1 %327, %v66_v10   ;;  %322 = vmatpush.msrb.mxu3 %v51_v2  ;;  %v67_v11 = vld [vmem:[%s531_s6 + $0x10] sm:$0xff]  ;;  %v62_v12 = vld [vmem:[%s530_s5 + $0x8] sm:$0xff]  ;;  %vm194_vm1 = vcmask 261120   ;;  %s300_s22 = sshll.u32 %s539_s14, 4  ;;  %s301_s22 = int_to_ptr.hbm [resolvable:$true] %s300_s22 }
   0xb   :  { %328 = vset.pattern.permute.xlu2 %v355_v4  ;;  %v60_v13 = vld [vmem:[%s529_s4 + $0x18] sm:$0xff]  ;;  %v58_v14 = vld [vmem:[%s529_s4 + $0x8] sm:$0xff]  ;;  %v65_v15 = vld [vmem:[%s531_s6] sm:$0xff] }
   0xc   :  { %323 = vmatpush.msrb.mxu3 %v50_v6  ;;  %v227_v16 = vld [vmem:[%s535_s10] sm:$0xff]  ;;  %v63_v17 = vld [vmem:[%s530_s5 + $0x10] sm:$0xff]  ;;  %v183_v23 = vld [vmem:[%s533_s8 + $0x8] sm:$0xff] }
   0xd   :  { %v59_v18 = vld [vmem:[%s529_s4 + $0x10] sm:$0xff]  ;;  %v257_v19 = vld [vmem:[%s536_s11] sm:$0xff]  ;;  %191 = vperm.xlu2 %328, %v183_v23   ;;  %v181_v49 = vld [vmem:[%s532_s7 + $0x8] sm:$0xff] }
   0xe   :  { %164 = vperm.xlu0 %326, %v67_v11   ;;  %v259_v20 = vld [vmem:[#allocation2] sm:$0x1] }
   0xf   :  { %v182_v29 = vld [vmem:[%s533_s8] sm:$0xff] }
  0x10   :  { %310 = vmatmul.msk.f32.gmra.mxu0 %vm69_vm0, %v62_v12  ;;  %316 = vmatmul.msk.f32.vlgmr.msrb.gmra.mxu3 %vm69_vm0, %v60_v13  ;;  %v258_v40 = vld [vmem:[%s537_s12] sm:$0xff] }
  0x11   :  { %314 = vmatmul.msk.f32.gmra.mxu1 %vm69_vm0, %v58_v14  ;;  %v180_v48 = vld [vmem:[%s532_s7] sm:$0xff] }
  0x12   :  { %154 = vperm.xlu1 %327, %v65_v15   ;;  %v226_v58 = vld [vmem:[%s534_s9] sm:$0xff] }
  0x13   :  { %v54_v59 = vld [vmem:[%s527_s2] sm:$0xff]  ;;  %s356_s2 = smov [#allocation3]  }
  0x14   :  { %v55_v60 = vld [vmem:[%s528_s3] sm:$0xff]  ;;  %s298_s3 = sshll.u32 %s356_s2, 4  ;;  %s299_s3 = int_to_ptr.vmem [resolvable:$true] %s298_s3 }
  0x15   :  { %186 = vperm.xlu2 %328, %v182_v29   ;;  %v56_v61 = vmul.f32 %v55_v60, %v54_v59 }
  0x16   :  { %230 = vperm.xlu0 %326, %v227_v16  }
  0x18   :  { %311 = vmatmul.msk.f32.gmra.mxu0 %vm69_vm0, %v63_v17 }
  0x19   :  { %315 = vmatmul.msk.f32.gmra.mxu1 %vm69_vm0, %v59_v18 }
  0x1a   :  { %262 = vperm.xlu1 %327, %v257_v19  }
  0x1d   :  { %274 = vperm.xlu2 %328, %v258_v40  }
  0x1e   :  { %287 = vperm.xlu0 %326, %v259_v20  }
  0x67   :  { %v192_v50 = vpop.permute.xlu2 %191 }
  0x6f   :  { %v187_v52 = vpop.permute.xlu2 %186 }
  0x77   :  { %v275_v6 = vpop.permute.xlu2 %274 }
  0x78   :  { %v170_v26 = vpop.permute.xlu0 %169 }
  0x7c   :  { %v160_v28 = vpop.permute.xlu1 %159 }
  0x80   :  { %v165_v38 = vpop.permute.xlu0 %164 }
  0x84   :  { %v155_v43 = vpop.permute.xlu1 %154 }
  0x85   :  { %v99_v21 = vpop.f32.mrf.mxu0 }
  0x86   :  { %v140_v22 = vpop.f32.mrf.mxu1 }
  0x87   :  { %v141_v36 = vadd.f32 %v140_v22, %v99_v21 }
  0x88   :  { %v231_v1 = vpop.permute.xlu0 %230 }
  0x89   :  { %v172_v45 = vadd.f32 %v155_v43, %v141_v36 }
  0x8b   :  { %v108_v24 = vpop.f32.mrf.mxu3  ;;  %v176_v47 = vmax.f32 %v172_v45, 0.0 }
  0x8c   :  { %v263_v62 = vpop.permute.xlu1 %262 }
  0x8d   :  { %v102_v25 = vpop.f32.mrf.mxu0  ;;  %v265_v63 = vmul.f32 %v263_v62, %v56_v61 }
  0x8e   :  { %v143_v27 = vpop.f32.mrf.mxu1 }
  0x8f   :  { %v144_v32 = vadd.f32 %v143_v27, %v102_v25  ;;  %v266_v0 = vrot.slane %v265_v63, 4 }
  0x90   :  { %v288_v16 = vpop.permute.xlu0 %287 }
  0x91   :  { %v173_v42 = vadd.f32 %v160_v28, %v144_v32  ;;  %v267_v3 = vadd.f32 %v266_v0, %v265_v63  ;;  %v290_v19 = vperm.slane %v288_v16, 0 }
  0x93   :  { %v149_v30 = vpop.f32.mrf.mxu3  ;;  %v177_v46 = vmax.f32 %v173_v42, 0.0  ;;  %v268_v7 = vrot.slane %v267_v3, 2 }
  0x94   :  { %v150_v31 = vadd.f32 %v149_v30, %v108_v24 }
  0x95   :  { %v105_v33 = vpop.f32.mrf.mxu0  ;;  %v269_v10 = vadd.f32 %v268_v7, %v267_v3 }
  0x96   :  { %v146_v34 = vpop.f32.mrf.mxu1  ;;  %v175_v35 = vadd.f32 %v170_v26, %v150_v31 }
  0x97   :  { %v147_v37 = vadd.f32 %v146_v34, %v105_v33  ;;  %v270_v13 = vrot.slane %v269_v10, 1 }
  0x98   :  { %v179_v39 = vmax.f32 %v175_v35, 0.0 }
  0x99   :  { %v174_v41 = vadd.f32 %v165_v38, %v147_v37  ;;  %v271_v17 = vadd.f32 %v270_v13, %v269_v10 }
  0x9a   :  { %213 = vmatpush.msra.mxu2 %v179_v39 }
  0x9b   :  { %v178_v44 = vmax.f32 %v174_v41, 0.0 }
  0x9d   :  { %214 = vmatpush.msra.mxu2 %v178_v44 }
  0x9f   :  { %215 = vmatpush.msra.mxu2 %v177_v46 }
  0xa1   :  { %216 = vmatpush.msra.mxu2 %v176_v47 }
  0xa2   :  { %317 = vmatmul.msk.f32.vlgmr.msra.gmra.mxu2 %vm194_vm1, %v180_v48 }
  0xaa   :  { %318 = vmatmul.msk.f32.gmra.mxu2 %vm194_vm1, %v181_v49 }
 0x125   :  { %v218_v51 = vpop.f32.mrf.mxu2 }
 0x126   :  { %v219_v54 = vadd.f32 %v218_v51, %v187_v52 }
 0x128   :  { %v224_v57 = vmax.f32 %v219_v54, 0.0 }
 0x12d   :  { %v221_v53 = vpop.f32.mrf.mxu2 }
 0x12e   :  { %v222_v55 = vadd.f32 %v221_v53, %v192_v50 }
 0x130   :  { %v225_v56 = vmax.f32 %v222_v55, 0.0 }
 0x132   :  { %250 = vmatpush.msra.mxu3 %v225_v56 }
 0x134   :  { %251 = vmatpush.msra.mxu3 %v224_v57 }
 0x135   :  { %319 = vmatmul.msk.f32.vlgmr.msra.gmra.mxu3 %vm69_vm0, %v226_v58 }
 0x1b8   :  { %v253_v2 = vpop.f32.mrf.mxu3 }
 0x1b9   :  { %v254_v4 = vadd.f32 %v253_v2, %v231_v1 }
 0x1bb   :  { %v256_v5 = vmax.f32 %v254_v4, 0.0 }
 0x1bd   :  { %v277_v8 = vmul.f32 %v275_v6, %v256_v5 }
 0x1bf   :  { %v278_v9 = vrot.slane %v277_v8, 4 }
 0x1c1   :  { %v279_v11 = vadd.f32 %v278_v9, %v277_v8 }
 0x1c3   :  { %v280_v12 = vrot.slane %v279_v11, 2 }
 0x1c5   :  { %v281_v14 = vadd.f32 %v280_v12, %v279_v11 }
 0x1c7   :  { %v282_v15 = vrot.slane %v281_v14, 1 }
 0x1c9   :  { %v283_v18 = vadd.f32 %v282_v15, %v281_v14 }
 0x1cb   :  { %v284_v20 = vadd.f32 %v283_v18, %v271_v17 }
 0x1cd   :  { %v291_v21 = vadd.f32 %v290_v19, %v284_v20 }
 0x1cf   :  { %292 = vst [vmem:[#allocation3] sm:$0x1] %v291_v21 }
 0x1d0   :  { %303 = dma.vmem_to_hbm [thread:$0]  %s299_s3, 16, %s301_s22, [#allocation4]  }
 0x1d1   :  { %353 = dma.done.wait [#allocation4], 16  }
 0x1d2   :  { %354 = vsyncadd [#allocation4], 4294967280 }
 0x1d3   :  { %308 = vsyncpa [#allocation4], 1 }

</bundles_post_ra>
